<compile_context>
chip_gen: v6e
topology: v6e:2x2x1
jax: 0.10.0
libtpu: 0.0.40
codegen_flags: <defaults>
</compile_context>

<pallas_src>
import functools

import jax
import jax.numpy as jnp
from jax.experimental import pallas as pl
from jax.experimental.pallas import tpu as pltpu

LANE = 128            # hidden/output feature dims padded to this (lane width)
SUBLANE = 8           # row granule
MAX_ROW_TILE = 512    # large row tiles amortize the ~0.35us per-grid-step overhead
# Keep all layer weights VMEM-resident only while they comfortably fit the
# smallest per-core VMEM (v7x: 64 MiB physical; the "parallel" row axis
# duplicates residents into both TensorCores).
RESIDENT_WEIGHT_BUDGET_BYTES = 40 * 1024 * 1024


def _round_up(v: int, m: int) -> int:
    return ((v + m - 1) // m) * m


def _choose_row_tiling(n: int):
    """Returns (padded_row_count, row_tile)."""
    n_p = _round_up(max(n, 1), SUBLANE)
    if n_p <= MAX_ROW_TILE:
        return n_p, n_p                       # single tile -> grid=(1,)
    # Prefer an even number of row tiles so v7x's two TensorCores stay balanced.
    for tm in (512, 256, 128):
        n_pad = _round_up(n_p, tm)
        if (n_pad // tm) % 2 == 0:
            return n_pad, tm
    return _round_up(n_p, 128), 128


def _mlp_fused_kernel(*refs, num_layers: int):
    """refs = (x_ref, w0, b0, w1, b1, ..., w_{L-1}, b_{L-1}, o_ref).

    y = x; per layer: y = y @ W + b, ReLU on all but the last layer.
    Weights are bf16 and VMEM-resident; matmuls accumulate in f32 on the MXU;
    bias/ReLU run in f32 (v5e's VPU has no bf16 path); all intermediates stay
    on-chip for the whole forward pass.
    """
    x_ref = refs[0]
    o_ref = refs[-1]
    wb = refs[1:-1]

    y = x_ref[...].astype(jnp.float32)
    for i in range(num_layers):
        w = wb[2 * i][...]            # (d_in_i, d_out_i_padded) bf16, resident
        b = wb[2 * i + 1][...]        # (1, d_out_i_padded) f32, broadcast rows
        y = jnp.dot(y.astype(jnp.bfloat16), w,
                    preferred_element_type=jnp.float32) + b
        if i < num_layers - 1:
            y = jnp.maximum(y, 0.0)
    # TODO(synk): for hidden_p >= 512, stage y through an explicit VMEM scratch
    # (scratch_shapes=[pltpu.VMEM((tm, max_hidden_p), f32)]) so regalloc spills
    # stay off the vld/vst slots.
    o_ref[...] = y.astype(o_ref.dtype)


def _build_mlp_call(x2, padded_params, num_layers, tm, single_buffer_weights):
    n_p, d_in = x2.shape
    d_out_p = padded_params[-1][0].shape[1]
    grid = (n_p // tm,)

    # Input rows are streamed per row-tile; the feature dim keeps its true width
    # (block dim == full array dim is legal) so we never DMA padded input cols.
    in_specs = [pl.BlockSpec((tm, d_in), lambda i: (i, 0))]
    flat_args = [x2]

    const_kwargs = {}
    if single_buffer_weights:
        # Constant block index across the row grid -> single buffer is enough;
        # double-buffering resident weights is pure VMEM waste.
        const_kwargs = dict(pipeline_mode=pl.Buffered(1))

    weight_bytes = 0
    for (w, b) in padded_params:
        in_specs.append(pl.BlockSpec(w.shape, lambda i: (0, 0), **const_kwargs))
        in_specs.append(pl.BlockSpec(b.shape, lambda i: (0, 0), **const_kwargs))
        flat_args += [w, b]
        weight_bytes += w.size * w.dtype.itemsize + b.size * b.dtype.itemsize

    if weight_bytes > RESIDENT_WEIGHT_BUDGET_BYTES:
        # TODO(synk): stream weight K/N tiles per layer (contraction grid axis +
        # f32 accumulator scratch with pl.when init/finalize, or
        # pltpu.emit_pipeline over memory_space=pl.ANY weights) once the
        # resident-weight footprint no longer fits v7x VMEM.
        raise NotImplementedError("weights too large for the VMEM-resident path")

    # VMEM budget from actual residency: weights (single- or double-buffered),
    # double-buffered input/output row tiles, headroom for the intermediate y.
    buf_mult = 1 if single_buffer_weights else 2
    max_mid_p = max(w.shape[1] for (w, _) in padded_params)
    vmem_bytes = (buf_mult * weight_bytes
                  + 2 * tm * d_in * x2.dtype.itemsize
                  + 2 * tm * d_out_p * 4
                  + 2 * tm * max_mid_p * 4
                  + (4 << 20))
    vmem_bytes = min(max(vmem_bytes, 32 << 20), 64 << 20)

    flops = 2 * n_p * sum(w.shape[0] * w.shape[1] for (w, _) in padded_params)
    bytes_accessed = (x2.size * x2.dtype.itemsize + weight_bytes
                      + n_p * d_out_p * 4)

    call = pl.pallas_call(
        functools.partial(_mlp_fused_kernel, num_layers=num_layers),
        out_shape=jax.ShapeDtypeStruct((n_p, d_out_p), x2.dtype),
        grid=grid,
        in_specs=in_specs,
        out_specs=pl.BlockSpec((tm, d_out_p), lambda i: (i, 0)),
        compiler_params=pltpu.CompilerParams(
            dimension_semantics=("parallel",),
            vmem_limit_bytes=int(vmem_bytes),
        ),
        cost_estimate=pl.CostEstimate(
            flops=int(flops),
            transcendentals=0,
            bytes_accessed=int(bytes_accessed),
        ),
    )
    return call, flat_args


def mlp_fused_pallas(x2, padded_params, num_layers, tm):
    try:
        call, flat_args = _build_mlp_call(
            x2, padded_params, num_layers, tm, single_buffer_weights=True)
        return call(*flat_args)
    except NotImplementedError:
        raise
    except Exception:
        # Fallback for jax builds where pipeline_mode=pl.Buffered(1) is not
        # honored on pallas_call BlockSpecs: keep default double-buffering.
        call, flat_args = _build_mlp_call(
            x2, padded_params, num_layers, tm, single_buffer_weights=False)
        return call(*flat_args)


class MLPPallas:
    """Mirrors the PyTorch MLP: num_layers Linear layers, ReLU on all but last."""

    def __init__(self, input_dim, hidden_dim, output_dim, num_layers, key):
        self.num_layers = num_layers
        self.input_dim = input_dim
        self.output_dim = output_dim

        h = [hidden_dim] * (num_layers - 1)
        dims_in = [input_dim] + h
        dims_out = h + [output_dim]

        self.params = []          # real-sized f32 params for the pure-JAX reference
        self.padded_params = []   # kernel operands: bf16 W (lane-padded), f32 b
        prev_out_p = input_dim    # layer-0 K dim stays at the TRUE input width
        for (n_in, n_out) in zip(dims_in, dims_out):
            key, wk, bk = jax.random.split(key, 3)
            bound = 1.0 / float(n_in) ** 0.5   # nn.Linear default-ish init
            w = jax.random.uniform(wk, (n_in, n_out), jnp.float32, -bound, bound)
            b = jax.random.uniform(bk, (1, n_out), jnp.float32, -bound, bound)
            self.params.append((w, b))

            n_out_p = _round_up(n_out, LANE)
            # TODO(synk): pad N-out to 256 on v6e/v7x (2x256x256 MXU) once
            # hidden_dim grows past toy sizes; 128 is native on v5e.
            n_in_p = prev_out_p
            # Zero-padded weight rows/cols + zero bias lanes keep the padded
            # activation lanes exactly 0 through bias+ReLU, so they contribute
            # nothing to the next layer.
            w_p = jnp.zeros((n_in_p, n_out_p), jnp.float32).at[:n_in, :n_out].set(w)
            b_p = jnp.zeros((1, n_out_p), jnp.float32).at[:, :n_out].set(b)
            self.padded_params.append((w_p.astype(jnp.bfloat16), b_p))
            prev_out_p = n_out_p

    def __call__(self, x):
        # Flatten leading dims so the kernel only ever sees 2-D (N, D); pad rows
        # to the sublane/row-tile granule (features are NOT padded for the input).
        lead_shape = x.shape[:-1]
        x2 = x.reshape((-1, x.shape[-1]))
        n = x2.shape[0]

        n_p, tm = _choose_row_tiling(n)
        if n_p == n:
            x_p = x2
        else:
            x_p = jnp.zeros((n_p, x2.shape[1]), x2.dtype).at[:n].set(x2)

        out_p = mlp_fused_pallas(x_p, self.padded_params, self.num_layers, tm)

        out = out_p[:n, : self.output_dim]
        return out.reshape(lead_shape + (self.output_dim,))


def mlp_reference(x, params, num_layers):
    """Plain-JAX f32 reference (real-sized params) for the correctness check."""
    lead_shape = x.shape[:-1]
    y = x.reshape((-1, x.shape[-1]))
    for i, (w, b) in enumerate(params):
        y = y @ w + b
        if i < num_layers - 1:
            y = jnp.maximum(y, 0.0)
    return y.reshape(lead_shape + (y.shape[-1],))


if __name__ == "__main__":
    key = jax.random.PRNGKey(0)
    key, xkey, pkey = jax.random.split(key, 3)

    # Small shapes consistent with the module (DETR bbox-head style usage):
    # (batch, seq, input_dim); the forward treats the last dim as features.
    batch, seq = 2, 8
    input_dim, hidden_dim, output_dim, num_layers = 32, 64, 16, 3

    x = jax.random.normal(xkey, (batch, seq, input_dim), jnp.float32)

    mlp = MLPPallas(input_dim, hidden_dim, output_dim, num_layers, pkey)

    out = jax.block_until_ready(mlp(x))
    ref = mlp_reference(x, mlp.params, num_layers)

    assert out.shape == (batch, seq, output_dim), out.shape
    # bf16 weights/activation operands with f32 accumulation: relaxed tolerance
    # vs the f32 reference (per review).
    max_err = float(jnp.max(jnp.abs(out - ref)))
    assert jnp.allclose(out, ref, atol=5e-2, rtol=5e-2), f"max|err|={max_err}"

    print("KERNEL_OK")
</pallas_src>

<mosaic_0001>
module attributes {stable_mosaic.version = 11 : i64} {
  func.func @_mlp_fused_kernel(%arg0: i32, %arg1: memref<16x32xf32, #tpu.memory_space<vmem>>, %arg2: memref<32x128xbf16, #tpu.memory_space<vmem>>, %arg3: memref<1x128xf32, #tpu.memory_space<vmem>>, %arg4: memref<128x128xbf16, #tpu.memory_space<vmem>>, %arg5: memref<1x128xf32, #tpu.memory_space<vmem>>, %arg6: memref<128x128xbf16, #tpu.memory_space<vmem>>, %arg7: memref<1x128xf32, #tpu.memory_space<vmem>>, %arg8: memref<16x128xf32, #tpu.memory_space<vmem>>) attributes {dimension_semantics = [#tpu.dimension_semantics<parallel>], iteration_bounds = array<i64: 1>, scalar_prefetch = 0 : i64, scratch_operands = 0 : i64, tpu.core_type = #tpu.core_type<tc>, window_params = [{transform_indices = @transform_0, window_bounds = array<i64: 16, 32>}, {pipeline_mode = #tpu.pipeline_mode<synchronous>, transform_indices = @transform_1, window_bounds = array<i64: 32, 128>}, {pipeline_mode = #tpu.pipeline_mode<synchronous>, transform_indices = @transform_2, window_bounds = array<i64: 1, 128>}, {pipeline_mode = #tpu.pipeline_mode<synchronous>, transform_indices = @transform_3, window_bounds = array<i64: 128, 128>}, {pipeline_mode = #tpu.pipeline_mode<synchronous>, transform_indices = @transform_4, window_bounds = array<i64: 1, 128>}, {pipeline_mode = #tpu.pipeline_mode<synchronous>, transform_indices = @transform_5, window_bounds = array<i64: 128, 128>}, {pipeline_mode = #tpu.pipeline_mode<synchronous>, transform_indices = @transform_6, window_bounds = array<i64: 1, 128>}, {transform_indices = @transform_7, window_bounds = array<i64: 16, 128>}]} {
    %c0 = arith.constant 0 : index
    %c0_0 = arith.constant 0 : index
    %0 = vector.load %arg1[%c0, %c0_0] : memref<16x32xf32, #tpu.memory_space<vmem>>, vector<16x32xf32>
    %c0_1 = arith.constant 0 : index
    %c0_2 = arith.constant 0 : index
    %1 = vector.load %arg2[%c0_1, %c0_2] : memref<32x128xbf16, #tpu.memory_space<vmem>>, vector<32x128xbf16>
    %c0_3 = arith.constant 0 : index
    %c0_4 = arith.constant 0 : index
    %2 = vector.load %arg3[%c0_3, %c0_4] : memref<1x128xf32, #tpu.memory_space<vmem>>, vector<1x128xf32>
    %3 = arith.truncf %0 : vector<16x32xf32> to vector<16x32xbf16>
    %cst = arith.constant dense<0.000000e+00> : vector<16x128xf32>
    %4 = tpu.matmul %3, %1, %cst {dimension_numbers = #tpu.dot_dimension_numbers<[1], [0], [0], [1], [0, 0, 1, 1], [], []>} : vector<16x32xbf16>, vector<32x128xbf16>, vector<16x128xf32> -> vector<16x128xf32>
    %5 = vector.broadcast %2 : vector<1x128xf32> to vector<16x128xf32>
    %6 = arith.addf %4, %5 : vector<16x128xf32>
    %cst_5 = arith.constant 0.000000e+00 : f32
    %7 = vector.broadcast %cst_5 : f32 to vector<16x128xf32>
    %8 = arith.maximumf %6, %7 : vector<16x128xf32>
    %c0_6 = arith.constant 0 : index
    %c0_7 = arith.constant 0 : index
    %9 = vector.load %arg4[%c0_6, %c0_7] : memref<128x128xbf16, #tpu.memory_space<vmem>>, vector<128x128xbf16>
    %c0_8 = arith.constant 0 : index
    %c0_9 = arith.constant 0 : index
    %10 = vector.load %arg5[%c0_8, %c0_9] : memref<1x128xf32, #tpu.memory_space<vmem>>, vector<1x128xf32>
    %11 = arith.truncf %8 : vector<16x128xf32> to vector<16x128xbf16>
    %cst_10 = arith.constant dense<0.000000e+00> : vector<16x128xf32>
    %12 = tpu.matmul %11, %9, %cst_10 {dimension_numbers = #tpu.dot_dimension_numbers<[1], [0], [0], [1], [0, 0, 1, 1], [], []>} : vector<16x128xbf16>, vector<128x128xbf16>, vector<16x128xf32> -> vector<16x128xf32>
    %13 = vector.broadcast %10 : vector<1x128xf32> to vector<16x128xf32>
    %14 = arith.addf %12, %13 : vector<16x128xf32>
    %cst_11 = arith.constant 0.000000e+00 : f32
    %15 = vector.broadcast %cst_11 : f32 to vector<16x128xf32>
    %16 = arith.maximumf %14, %15 : vector<16x128xf32>
    %c0_12 = arith.constant 0 : index
    %c0_13 = arith.constant 0 : index
    %17 = vector.load %arg6[%c0_12, %c0_13] : memref<128x128xbf16, #tpu.memory_space<vmem>>, vector<128x128xbf16>
    %c0_14 = arith.constant 0 : index
    %c0_15 = arith.constant 0 : index
    %18 = vector.load %arg7[%c0_14, %c0_15] : memref<1x128xf32, #tpu.memory_space<vmem>>, vector<1x128xf32>
    %19 = arith.truncf %16 : vector<16x128xf32> to vector<16x128xbf16>
    %cst_16 = arith.constant dense<0.000000e+00> : vector<16x128xf32>
    %20 = tpu.matmul %19, %17, %cst_16 {dimension_numbers = #tpu.dot_dimension_numbers<[1], [0], [0], [1], [0, 0, 1, 1], [], []>} : vector<16x128xbf16>, vector<128x128xbf16>, vector<16x128xf32> -> vector<16x128xf32>
    %21 = vector.broadcast %18 : vector<1x128xf32> to vector<16x128xf32>
    %22 = arith.addf %20, %21 : vector<16x128xf32>
    %c0_17 = arith.constant 0 : index
    %c0_18 = arith.constant 0 : index
    %23 = vector.load %arg8[%c0_17, %c0_18] : memref<16x128xf32, #tpu.memory_space<vmem>>, vector<16x128xf32>
    tpu.vector_store %arg8[%c0_17, %c0_18], %22 {strides = array<i32>} : memref<16x128xf32, #tpu.memory_space<vmem>>, vector<16x128xf32>,
    return
  }
  func.func @transform_0(%arg0: i32) -> (i32, i32) {
    %c0_i32 = arith.constant 0 : i32
    %c0_i32_0 = arith.constant 0 : i32
    return %arg0, %c0_i32 : i32, i32
  }
  func.func @transform_1(%arg0: i32) -> (i32, i32) {
    %c0_i32 = arith.constant 0 : i32
    %c0_i32_0 = arith.constant 0 : i32
    %c0_i32_1 = arith.constant 0 : i32
    return %c0_i32, %c0_i32_0 : i32, i32
  }
  func.func @transform_2(%arg0: i32) -> (i32, i32) {
    %c0_i32 = arith.constant 0 : i32
    %c0_i32_0 = arith.constant 0 : i32
    %c0_i32_1 = arith.constant 0 : i32
    return %c0_i32, %c0_i32_0 : i32, i32
  }
  func.func @transform_3(%arg0: i32) -> (i32, i32) {
    %c0_i32 = arith.constant 0 : i32
    %c0_i32_0 = arith.constant 0 : i32
    %c0_i32_1 = arith.constant 0 : i32
    return %c0_i32, %c0_i32_0 : i32, i32
  }
  func.func @transform_4(%arg0: i32) -> (i32, i32) {
    %c0_i32 = arith.constant 0 : i32
    %c0_i32_0 = arith.constant 0 : i32
    %c0_i32_1 = arith.constant 0 : i32
    return %c0_i32, %c0_i32_0 : i32, i32
  }
  func.func @transform_5(%arg0: i32) -> (i32, i32) {
    %c0_i32 = arith.constant 0 : i32
    %c0_i32_0 = arith.constant 0 : i32
    %c0_i32_1 = arith.constant 0 : i32
    return %c0_i32, %c0_i32_0 : i32, i32
  }
  func.func @transform_6(%arg0: i32) -> (i32, i32) {
    %c0_i32 = arith.constant 0 : i32
    %c0_i32_0 = arith.constant 0 : i32
    %c0_i32_1 = arith.constant 0 : i32
    return %c0_i32, %c0_i32_0 : i32, i32
  }
  func.func @transform_7(%arg0: i32) -> (i32, i32) {
    %c0_i32 = arith.constant 0 : i32
    %c0_i32_0 = arith.constant 0 : i32
    return %arg0, %c0_i32 : i32, i32
  }
}

module attributes {stable_mosaic.version = 11 : i64} {
  func.func @_mlp_fused_kernel(%arg0: i32, %arg1: memref<16x32xf32, #tpu.memory_space<vmem>>, %arg2: memref<32x128xbf16, #tpu.memory_space<vmem>>, %arg3: memref<1x128xf32, #tpu.memory_space<vmem>>, %arg4: memref<128x128xbf16, #tpu.memory_space<vmem>>, %arg5: memref<1x128xf32, #tpu.memory_space<vmem>>, %arg6: memref<128x128xbf16, #tpu.memory_space<vmem>>, %arg7: memref<1x128xf32, #tpu.memory_space<vmem>>, %arg8: memref<16x128xf32, #tpu.memory_space<vmem>>) attributes {dimension_semantics = [#tpu.dimension_semantics<parallel>], iteration_bounds = array<i64: 1>, scalar_prefetch = 0 : i64, scratch_operands = 0 : i64, tpu.core_type = #tpu.core_type<tc>, window_params = [{transform_indices = @transform_0, window_bounds = array<i64: 16, 32>}, {pipeline_mode = #tpu.pipeline_mode<synchronous>, transform_indices = @transform_1, window_bounds = array<i64: 32, 128>}, {pipeline_mode = #tpu.pipeline_mode<synchronous>, transform_indices = @transform_2, window_bounds = array<i64: 1, 128>}, {pipeline_mode = #tpu.pipeline_mode<synchronous>, transform_indices = @transform_3, window_bounds = array<i64: 128, 128>}, {pipeline_mode = #tpu.pipeline_mode<synchronous>, transform_indices = @transform_4, window_bounds = array<i64: 1, 128>}, {pipeline_mode = #tpu.pipeline_mode<synchronous>, transform_indices = @transform_5, window_bounds = array<i64: 128, 128>}, {pipeline_mode = #tpu.pipeline_mode<synchronous>, transform_indices = @transform_6, window_bounds = array<i64: 1, 128>}, {transform_indices = @transform_7, window_bounds = array<i64: 16, 128>}]} {
    %c0 = arith.constant 0 : index
    %c0_0 = arith.constant 0 : index
    %0 = vector.load %arg1[%c0, %c0_0] : memref<16x32xf32, #tpu.memory_space<vmem>>, vector<16x32xf32>
    %c0_1 = arith.constant 0 : index
    %c0_2 = arith.constant 0 : index
    %1 = vector.load %arg2[%c0_1, %c0_2] : memref<32x128xbf16, #tpu.memory_space<vmem>>, vector<32x128xbf16>
    %c0_3 = arith.constant 0 : index
    %c0_4 = arith.constant 0 : index
    %2 = vector.load %arg3[%c0_3, %c0_4] : memref<1x128xf32, #tpu.memory_space<vmem>>, vector<1x128xf32>
    %3 = arith.truncf %0 : vector<16x32xf32> to vector<16x32xbf16>
    %cst = arith.constant dense<0.000000e+00> : vector<16x128xf32>
    %4 = tpu.matmul %3, %1, %cst {dimension_numbers = #tpu.dot_dimension_numbers<[1], [0], [0], [1], [0, 0, 1, 1], [], []>} : vector<16x32xbf16>, vector<32x128xbf16>, vector<16x128xf32> -> vector<16x128xf32>
    %5 = vector.broadcast %2 : vector<1x128xf32> to vector<16x128xf32>
    %6 = arith.addf %4, %5 : vector<16x128xf32>
    %cst_5 = arith.constant 0.000000e+00 : f32
    %7 = vector.broadcast %cst_5 : f32 to vector<16x128xf32>
    %8 = arith.maximumf %6, %7 : vector<16x128xf32>
    %c0_6 = arith.constant 0 : index
    %c0_7 = arith.constant 0 : index
    %9 = vector.load %arg4[%c0_6, %c0_7] : memref<128x128xbf16, #tpu.memory_space<vmem>>, vector<128x128xbf16>
    %c0_8 = arith.constant 0 : index
    %c0_9 = arith.constant 0 : index
    %10 = vector.load %arg5[%c0_8, %c0_9] : memref<1x128xf32, #tpu.memory_space<vmem>>, vector<1x128xf32>
    %11 = arith.truncf %8 : vector<16x128xf32> to vector<16x128xbf16>
    %cst_10 = arith.constant dense<0.000000e+00> : vector<16x128xf32>
    %12 = tpu.matmul %11, %9, %cst_10 {dimension_numbers = #tpu.dot_dimension_numbers<[1], [0], [0], [1], [0, 0, 1, 1], [], []>} : vector<16x128xbf16>, vector<128x128xbf16>, vector<16x128xf32> -> vector<16x128xf32>
    %13 = vector.broadcast %10 : vector<1x128xf32> to vector<16x128xf32>
    %14 = arith.addf %12, %13 : vector<16x128xf32>
    %cst_11 = arith.constant 0.000000e+00 : f32
    %15 = vector.broadcast %cst_11 : f32 to vector<16x128xf32>
    %16 = arith.maximumf %14, %15 : vector<16x128xf32>
    %c0_12 = arith.constant 0 : index
    %c0_13 = arith.constant 0 : index
    %17 = vector.load %arg6[%c0_12, %c0_13] : memref<128x128xbf16, #tpu.memory_space<vmem>>, vector<128x128xbf16>
    %c0_14 = arith.constant 0 : index
    %c0_15 = arith.constant 0 : index
    %18 = vector.load %arg7[%c0_14, %c0_15] : memref<1x128xf32, #tpu.memory_space<vmem>>, vector<1x128xf32>
    %19 = arith.truncf %16 : vector<16x128xf32> to vector<16x128xbf16>
    %cst_16 = arith.constant dense<0.000000e+00> : vector<16x128xf32>
    %20 = tpu.matmul %19, %17, %cst_16 {dimension_numbers = #tpu.dot_dimension_numbers<[1], [0], [0], [1], [0, 0, 1, 1], [], []>} : vector<16x128xbf16>, vector<128x128xbf16>, vector<16x128xf32> -> vector<16x128xf32>
    %21 = vector.broadcast %18 : vector<1x128xf32> to vector<16x128xf32>
    %22 = arith.addf %20, %21 : vector<16x128xf32>
    %c0_17 = arith.constant 0 : index
    %c0_18 = arith.constant 0 : index
    %23 = vector.load %arg8[%c0_17, %c0_18] : memref<16x128xf32, #tpu.memory_space<vmem>>, vector<16x128xf32>
    tpu.vector_store %arg8[%c0_17, %c0_18], %22 {strides = array<i32>} : memref<16x128xf32, #tpu.memory_space<vmem>>, vector<16x128xf32>,
    return
  }
  func.func @transform_0(%arg0: i32) -> (i32, i32) {
    %c0_i32 = arith.constant 0 : i32
    %c0_i32_0 = arith.constant 0 : i32
    return %arg0, %c0_i32 : i32, i32
  }
  func.func @transform_1(%arg0: i32) -> (i32, i32) {
    %c0_i32 = arith.constant 0 : i32
    %c0_i32_0 = arith.constant 0 : i32
    %c0_i32_1 = arith.constant 0 : i32
    return %c0_i32, %c0_i32_0 : i32, i32
  }
  func.func @transform_2(%arg0: i32) -> (i32, i32) {
    %c0_i32 = arith.constant 0 : i32
    %c0_i32_0 = arith.constant 0 : i32
    %c0_i32_1 = arith.constant 0 : i32
    return %c0_i32, %c0_i32_0 : i32, i32
  }
  func.func @transform_3(%arg0: i32) -> (i32, i32) {
    %c0_i32 = arith.constant 0 : i32
    %c0_i32_0 = arith.constant 0 : i32
    %c0_i32_1 = arith.constant 0 : i32
    return %c0_i32, %c0_i32_0 : i32, i32
  }
  func.func @transform_4(%arg0: i32) -> (i32, i32) {
    %c0_i32 = arith.constant 0 : i32
    %c0_i32_0 = arith.constant 0 : i32
    %c0_i32_1 = arith.constant 0 : i32
    return %c0_i32, %c0_i32_0 : i32, i32
  }
  func.func @transform_5(%arg0: i32) -> (i32, i32) {
    %c0_i32 = arith.constant 0 : i32
    %c0_i32_0 = arith.constant 0 : i32
    %c0_i32_1 = arith.constant 0 : i32
    return %c0_i32, %c0_i32_0 : i32, i32
  }
  func.func @transform_6(%arg0: i32) -> (i32, i32) {
    %c0_i32 = arith.constant 0 : i32
    %c0_i32_0 = arith.constant 0 : i32
    %c0_i32_1 = arith.constant 0 : i32
    return %c0_i32, %c0_i32_0 : i32, i32
  }
  func.func @transform_7(%arg0: i32) -> (i32, i32) {
    %c0_i32 = arith.constant 0 : i32
    %c0_i32_0 = arith.constant 0 : i32
    return %arg0, %c0_i32 : i32, i32
  }
}

</mosaic_0001>

<bundles_post_ra>
// kernel: tpu_custom_call.1
= control target key start
LH: loop header
LB: loop body
LE: loop exit
PB: predicated region body
PF: predicated region fallthrough
CT: control target
= control target key end

     0   :  { %12 = vsyncpa [#allocation3], 0  ;;  %s747_s0 = inlined_call_operand.hbm [shape: f32[16,32], index: 0, kind: input, shape index: {}]   ;;  %s748_s1 = inlined_call_operand.hbm [shape: bf16[32,128], index: 1, kind: input, shape index: {}]   ;;  %s749_s2 = inlined_call_operand.vmem [shape: f32[1,128], index: 2, kind: input, shape index: {}]   ;;  %s750_s3 = inlined_call_operand.hbm [shape: bf16[128,128], index: 3, kind: input, shape index: {}]   ;;  %s751_s4 = inlined_call_operand.vmem [shape: f32[1,128], index: 4, kind: input, shape index: {}]   ;;  %s752_s5 = inlined_call_operand.hbm [shape: bf16[128,128], index: 5, kind: input, shape index: {}]   ;;  %s753_s6 = inlined_call_operand.vmem [shape: f32[1,128], index: 6, kind: input, shape index: {}]   ;;  %s754_s7 = inlined_call_operand.hbm [shape: f32[16,128], index: 7, kind: output, shape index: {}]  }
   0x1   :  { %13 = vsyncpa [#allocation6], 0 }
   0x2   :  { %14 = vsyncpa [#allocation9], 0 }
   0x3   :  { %15 = vsyncpa [#allocation4], 0  ;;  %s633_s24 = smov [#allocation5]  }
   0x4   :  { %s33_s25 = sshll.u32 %s633_s24, 4  ;;  %s34_s25 = int_to_ptr.vmem [resolvable:$true] %s33_s25 }
   0x5   :  { %s533_s26 = scalar_lea.vmem %s34_s25, 256  ;;  %p538_p1 = scmp.lt.s32.totalorder %s34_s25, %s34_s25 }
   0x6   :  { %p534_p0 = scmp.ne.s32.totalorder %s34_s25, %s533_s26  ;;  %p539_p2 = scmp.lt.s32.totalorder %s533_s26, %s533_s26 }
   0x8   :  { %p540_p3 = por %p539_p2, %p538_p1 }
   0xa   :  { %p541_p4 = pnand %p540_p3, %p534_p0 }
   0xc   :  { %544 = shalt.err (!%p541_p4)
}
   0xd   :  { %s634_s27 = smov 64   ;;  %s635_s28 = smov 4  }
   0xe   :  { %39 = dma.hbm_to_vmem [thread:$0]  %s748_s1, 256, %s34_s25, [#allocation6], %s634_s27, %s634_s27, %s635_s28  }
   0xf   :  { %s636_s8 = smov [#allocation2]  }
  0x10   :  { %s21_s9 = sshll.u32 %s636_s8, 4  ;;  %s22_s9 = int_to_ptr.vmem [resolvable:$true] %s21_s9 }
  0x11   :  { %s553_s10 = scalar_lea.vmem %s22_s9, 256  ;;  %p558_p6 = scmp.lt.s32.totalorder %s22_s9, %s22_s9 }
  0x12   :  { %p554_p5 = scmp.ne.s32.totalorder %s22_s9, %s553_s10  ;;  %p559_p7 = scmp.lt.s32.totalorder %s553_s10, %s553_s10 }
  0x14   :  { %p560_p8 = por %p559_p7, %p558_p6 }
  0x16   :  { %p561_p9 = pnand %p560_p8, %p554_p5 }
  0x18   :  { %564 = shalt.err (!%p561_p9)
}
  0x19   :  { %s637_s11 = smov 128   ;;  %s638_s12 = smov 8  }
  0x1a   :  { %27 = dma.hbm_to_vmem [thread:$0]  %s747_s0, 256, %s22_s9, [#allocation3], %s637_s11, %s637_s11, %s638_s12  }
  0x1b   :  { %s639_s1 = smov [#allocation7]   ;;  %s640_s16 = smov [#allocation8]  }
  0x1c   :  { %s47_s15 = sshll.u32 %s639_s1, 4  ;;  %s61_s17 = sshll.u32 %s640_s16, 4  ;;  %s48_s15 = int_to_ptr.vmem [resolvable:$true] %s47_s15  ;;  %s62_s17 = int_to_ptr.vmem [resolvable:$true] %s61_s17 }
  0x1d   :  { %s573_s18 = scalar_lea.vmem %s48_s15, 1024  ;;  %p578_p11 = scmp.lt.s32.totalorder %s48_s15, %s48_s15 }
  0x1e   :  { %p574_p10 = scmp.ne.s32.totalorder %s48_s15, %s573_s18  ;;  %p579_p12 = scmp.lt.s32.totalorder %s573_s18, %s573_s18 }
  0x20   :  { %p580_p13 = por %p579_p12, %p578_p11 }
  0x22   :  { %p581_p0 = pnand %p580_p13, %p574_p10 }
  0x24   :  { %584 = shalt.err (!%p581_p0)
}
  0x25   :  { %53 = dma.hbm_to_vmem [thread:$0]  %s750_s3, 1024, %s48_s15, [#allocation6], %s634_s27, %s634_s27, %s635_s28  }
  0x26   :  { %s593_s0 = scalar_lea.vmem %s62_s17, 1024  ;;  %p598_p2 = scmp.lt.s32.totalorder %s62_s17, %s62_s17 }
  0x27   :  { %p594_p1 = scmp.ne.s32.totalorder %s62_s17, %s593_s0  ;;  %p599_p3 = scmp.lt.s32.totalorder %s593_s0, %s593_s0 }
  0x29   :  { %p600_p4 = por %p599_p3, %p598_p2 }
  0x2b   :  { %p601_p5 = pnand %p600_p4, %p594_p1 }
  0x2d   :  { %604 = shalt.err (!%p601_p5)
}
  0x2e   :  { %67 = dma.hbm_to_vmem [thread:$0]  %s752_s5, 1024, %s62_s17, [#allocation9], %s634_s27, %s634_s27, %s635_s28  }
  0x2f   :  { %625 = dma.done.wait [#allocation3], 256  }
  0x30   :  { %626 = vsyncadd [#allocation3], 4294967040 }
  0x31   :  { %627 = dma.done.wait [#allocation6], 1280  }
  0x32   :  { %628 = vsyncadd [#allocation6], 4294966016 }
  0x33   :  { %629 = dma.done.wait [#allocation9], 1024  }
  0x34   :  { %630 = vsyncadd [#allocation9], 4294966272  ;;  %v641_v0 = vmov 0.0   ;;  %vm642_vm0 = vmmov 0   ;;  %v507_v1 = vld [vmem:[#allocation5 + $0x8] sm:$0xff]   ;;  %v508_v2 = vld [vmem:[#allocation5] sm:$0xff]  }
  0x35   :  { %448 = vmatprep.subr.bf16.mxu0 %v641_v0  ;;  %452 = vmatprep.mubr.msk.bf16.mxu0 %vm642_vm0, %v641_v0  ;;  %v83_v3 = vld [vmem:[#allocation2] sm:$0xff]  ;;  %v84_v4 = vld [vmem:[#allocation2 + $0x8] sm:$0xff]  ;;  %v509_v5 = vld [vmem:[#allocation7 + $0x38] sm:$0xff]   ;;  %vm109_vm1 = vcmask 261120   ;;  %s643_s26 = smov [#allocation10]  }
  0x36   :  { %456 = vmatprep.subr.bf16.mxu1 %v641_v0  ;;  %472 = vmatprep.mubr.msk.bf16.mxu1 %vm642_vm0, %v641_v0  ;;  %v90_v6 = vpack.c.bf16 %v84_v4, %v83_v3  ;;  %v510_v7 = vld [vmem:[#allocation7 + $0x30] sm:$0xff]   ;;  %v511_v8 = vld [vmem:[#allocation7 + $0x28] sm:$0xff]   ;;  %v512_v9 = vld [vmem:[#allocation7 + $0x20] sm:$0xff]   ;;  %s391_s27 = sshll.u32 %s643_s26, 4  ;;  %s392_s27 = int_to_ptr.vmem [resolvable:$true] %s391_s27 }
  0x37   :  { %449 = vmatpush3.bf16.msra.mxu0 %v507_v1  ;;  %457 = vmatpush3.bf16.msra.mxu1 %v509_v5  ;;  %v513_v10 = vld [vmem:[#allocation7 + $0x18] sm:$0xff]   ;;  %v514_v11 = vld [vmem:[#allocation7 + $0x10] sm:$0xff]   ;;  %v515_v12 = vld [vmem:[#allocation7 + $0x8] sm:$0xff]   ;;  %p610_p7 = scmp.lt.s32.totalorder %s392_s27, %s392_s27 }
  0x38   :  { %450 = vmatprep.subr.bf16.mxu0 %v641_v0  ;;  %458 = vmatprep.subr.bf16.mxu1 %v641_v0  ;;  %v516_v13 = vld [vmem:[#allocation7] sm:$0xff]   ;;  %v517_v14 = vld [vmem:[#allocation8 + $0x38] sm:$0xff]   ;;  %v518_v15 = vld [vmem:[#allocation8 + $0x30] sm:$0xff]  }
  0x39   :  { %v519_v16 = vld [vmem:[#allocation8 + $0x28] sm:$0xff]   ;;  %v520_v17 = vld [vmem:[#allocation8 + $0x20] sm:$0xff]   ;;  %v521_v18 = vld [vmem:[#allocation8 + $0x18] sm:$0xff]  }
  0x3a   :  { %v405_v19 = vld [vmem:[%s749_s2] ss:$0 sm:$0xff]  ;;  %v522_v29 = vld [vmem:[#allocation8 + $0x10] sm:$0xff]   ;;  %v523_v30 = vld [vmem:[#allocation8 + $0x8] sm:$0xff]  }
  0x3b   :  { %451 = vmatpush3.bf16.msra.mxu0 %v508_v2  ;;  %459 = vmatpush3.bf16.msra.mxu1 %v510_v7  ;;  %v524_v31 = vld [vmem:[#allocation8] sm:$0xff]  }
  0x3c   :  { %476 = vmatprep.subr.bf16.mxu0 %v641_v0  ;;  %460 = vmatprep.subr.bf16.mxu1 %v641_v0  ;;  %v409_v32 = vld [vmem:[%s751_s4] ss:$0 sm:$0xff]  ;;  %s605_s4 = scalar_lea.vmem %s392_s27, 256 }
  0x3d   :  { %v418_v42 = vld [vmem:[%s753_s6] ss:$0 sm:$0xff]  ;;  %p606_p6 = scmp.ne.s32.totalorder %s392_s27, %s605_s4  ;;  %p611_p8 = scmp.lt.s32.totalorder %s605_s4, %s605_s4 }
  0x3e   :  { %453 = vmatmul.mubr.msk.bf16.vlgmr.msra.gmra.mxu0 %vm109_vm1, %v90_v6 }
  0x3f   :  { %492 = vmatprep.mubr.msk.bf16.mxu0 %vm642_vm0, %v641_v0  ;;  %461 = vmatpush3.bf16.msra.mxu1 %v511_v8  ;;  %p612_p9 = por %p611_p8, %p610_p7 }
  0x40   :  { %462 = vmatprep.subr.bf16.mxu1 %v641_v0  ;;  %477 = vmatpush3.bf16.msra.mxu0 %v517_v14 }
  0x41   :  { %478 = vmatprep.subr.bf16.mxu0 %v641_v0  ;;  %p613_p10 = pnand %p612_p9, %p606_p6 }
  0x43   :  { %463 = vmatpush3.bf16.msra.mxu1 %v512_v9 }
  0x44   :  { %464 = vmatprep.subr.bf16.mxu1 %v641_v0  ;;  %479 = vmatpush3.bf16.msra.mxu0 %v518_v15 }
  0x45   :  { %480 = vmatprep.subr.bf16.mxu0 %v641_v0 }
  0x47   :  { %465 = vmatpush3.bf16.msra.mxu1 %v513_v10 }
  0x48   :  { %466 = vmatprep.subr.bf16.mxu1 %v641_v0  ;;  %481 = vmatpush3.bf16.msra.mxu0 %v519_v16 }
  0x49   :  { %482 = vmatprep.subr.bf16.mxu0 %v641_v0 }
  0x4b   :  { %467 = vmatpush3.bf16.msra.mxu1 %v514_v11 }
  0x4c   :  { %468 = vmatprep.subr.bf16.mxu1 %v641_v0  ;;  %483 = vmatpush3.bf16.msra.mxu0 %v520_v17 }
  0x4d   :  { %484 = vmatprep.subr.bf16.mxu0 %v641_v0 }
  0x4f   :  { %469 = vmatpush3.bf16.msra.mxu1 %v515_v12 }
  0x50   :  { %470 = vmatprep.subr.bf16.mxu1 %v641_v0  ;;  %485 = vmatpush3.bf16.msra.mxu0 %v521_v18 }
  0x51   :  { %486 = vmatprep.subr.bf16.mxu0 %v641_v0 }
  0x53   :  { %471 = vmatpush3.bf16.msra.mxu1 %v516_v13 }
  0x54   :  { %487 = vmatpush3.bf16.msra.mxu0 %v522_v29 }
  0x55   :  { %488 = vmatprep.subr.bf16.mxu0 %v641_v0 }
  0x58   :  { %489 = vmatpush3.bf16.msra.mxu0 %v523_v30 }
  0x59   :  { %490 = vmatprep.subr.bf16.mxu0 %v641_v0 }
  0x5c   :  { %491 = vmatpush3.bf16.msra.mxu0 %v524_v31 }
  0xfe   :  { %v147_v20 = vpop.f32.mrf.mxu0 }
  0xff   :  { %v148_v22 = vadd.f32 %v405_v19, %v147_v20 }
 0x100   :  { %v454_v21 = vpop.f32.mrf.mxu0 }
 0x101   :  { %v154_v26 = vmax.f32 %v148_v22, 0.0 }
 0x102   :  { %v150_v23 = vpop.f32.mrf.mxu0 }
 0x103   :  { %v151_v24 = vadd.f32 %v405_v19, %v150_v23 }
 0x104   :  { %v455_v25 = vpop.f32.mrf.mxu0 }
 0x105   :  { %v155_v27 = vmax.f32 %v151_v24, 0.0 }
 0x107   :  { %v173_v28 = vpack.c.bf16 %v155_v27, %v154_v26 }
 0x109   :  { %473 = vmatmul.mubr.bf16.vlgmr.msra.gmra.mxu1 %v173_v28 }
 0x1c9   :  { %v262_v33 = vpop.f32.mrf.mxu1 }
 0x1ca   :  { %v263_v35 = vadd.f32 %v409_v32, %v262_v33 }
 0x1cb   :  { %v474_v34 = vpop.f32.mrf.mxu1 }
 0x1cc   :  { %v269_v39 = vmax.f32 %v263_v35, 0.0 }
 0x1cd   :  { %v265_v36 = vpop.f32.mrf.mxu1 }
 0x1ce   :  { %v266_v37 = vadd.f32 %v409_v32, %v265_v36 }
 0x1cf   :  { %v475_v38 = vpop.f32.mrf.mxu1 }
 0x1d0   :  { %v270_v40 = vmax.f32 %v266_v37, 0.0 }
 0x1d2   :  { %v288_v41 = vpack.c.bf16 %v270_v40, %v269_v39 }
 0x1d4   :  { %493 = vmatmul.mubr.bf16.vlgmr.msra.gmra.mxu0 %v288_v41 }
 0x294   :  { %v377_v43 = vpop.f32.mrf.mxu0 }
 0x295   :  { %v378_v44 = vadd.f32 %v418_v42, %v377_v43 }
 0x296   :  { %v494_v45 = vpop.f32.mrf.mxu0 }
 0x297   :  { %384 = vst [vmem:[#allocation10] sm:$0xff] %v378_v44 }
 0x298   :  { %v380_v46 = vpop.f32.mrf.mxu0 }
 0x299   :  { %v381_v47 = vadd.f32 %v418_v42, %v380_v46 }
 0x29a   :  { %v495_v48 = vpop.f32.mrf.mxu0 }
 0x29b   :  { %385 = vst [vmem:[#allocation10 + $0x8] sm:$0xff] %v381_v47 }
 0x29c   :  { %616 = shalt.err (!%p613_p10)
}
 0x29d   :  { %397 = dma.vmem_to_hbm [thread:$0]  %s392_s27, 256, %s754_s7, [#allocation4], %s637_s11, %s637_s11, %s638_s12  }
 0x29e   :  { %631 = dma.done.wait [#allocation4], 256  }
 0x29f   :  { %632 = vsyncadd [#allocation4], 4294967040 }
 0x2a0   :  { %401 = vsyncpa [#allocation3], 1 }
 0x2a1   :  { %402 = vsyncpa [#allocation6], 1 }
 0x2a2   :  { %403 = vsyncpa [#allocation9], 1 }
 0x2a3   :  { %404 = vsyncpa [#allocation4], 1 }

// kernel: tpu_custom_call.1
= control target key start
LH: loop header
LB: loop body
LE: loop exit
PB: predicated region body
PF: predicated region fallthrough
CT: control target
= control target key end

     0   :  { %12 = vsyncpa [#allocation3], 0  ;;  %s747_s0 = inlined_call_operand.hbm [shape: f32[16,32], index: 0, kind: input, shape index: {}]   ;;  %s748_s1 = inlined_call_operand.hbm [shape: bf16[32,128], index: 1, kind: input, shape index: {}]   ;;  %s749_s2 = inlined_call_operand.vmem [shape: f32[1,128], index: 2, kind: input, shape index: {}]   ;;  %s750_s3 = inlined_call_operand.hbm [shape: bf16[128,128], index: 3, kind: input, shape index: {}]   ;;  %s751_s4 = inlined_call_operand.vmem [shape: f32[1,128], index: 4, kind: input, shape index: {}]   ;;  %s752_s5 = inlined_call_operand.hbm [shape: bf16[128,128], index: 5, kind: input, shape index: {}]   ;;  %s753_s6 = inlined_call_operand.vmem [shape: f32[1,128], index: 6, kind: input, shape index: {}]   ;;  %s754_s7 = inlined_call_operand.hbm [shape: f32[16,128], index: 7, kind: output, shape index: {}]  }
   0x1   :  { %13 = vsyncpa [#allocation6], 0 }
   0x2   :  { %14 = vsyncpa [#allocation9], 0 }
   0x3   :  { %15 = vsyncpa [#allocation4], 0  ;;  %s633_s24 = smov [#allocation5]  }
   0x4   :  { %s33_s25 = sshll.u32 %s633_s24, 4  ;;  %s34_s25 = int_to_ptr.vmem [resolvable:$true] %s33_s25 }
   0x5   :  { %s533_s26 = scalar_lea.vmem %s34_s25, 256  ;;  %p538_p1 = scmp.lt.s32.totalorder %s34_s25, %s34_s25 }
   0x6   :  { %p534_p0 = scmp.ne.s32.totalorder %s34_s25, %s533_s26  ;;  %p539_p2 = scmp.lt.s32.totalorder %s533_s26, %s533_s26 }
   0x8   :  { %p540_p3 = por %p539_p2, %p538_p1 }
   0xa   :  { %p541_p4 = pnand %p540_p3, %p534_p0 }
   0xc   :  { %544 = shalt.err (!%p541_p4)
}
   0xd   :  { %s634_s27 = smov 64   ;;  %s635_s28 = smov 4  }
   0xe   :  { %39 = dma.hbm_to_vmem [thread:$0]  %s748_s1, 256, %s34_s25, [#allocation6], %s634_s27, %s634_s27, %s635_s28  }
   0xf   :  { %s636_s8 = smov [#allocation2]  }
  0x10   :  { %s21_s9 = sshll.u32 %s636_s8, 4  ;;  %s22_s9 = int_to_ptr.vmem [resolvable:$true] %s21_s9 }
  0x11   :  { %s553_s10 = scalar_lea.vmem %s22_s9, 256  ;;  %p558_p6 = scmp.lt.s32.totalorder %s22_s9, %s22_s9 }
  0x12   :  { %p554_p5 = scmp.ne.s32.totalorder %s22_s9, %s553_s10  ;;  %p559_p7 = scmp.lt.s32.totalorder %s553_s10, %s553_s10 }
  0x14   :  { %p560_p8 = por %p559_p7, %p558_p6 }
  0x16   :  { %p561_p9 = pnand %p560_p8, %p554_p5 }
  0x18   :  { %564 = shalt.err (!%p561_p9)
}
  0x19   :  { %s637_s11 = smov 128   ;;  %s638_s12 = smov 8  }
  0x1a   :  { %27 = dma.hbm_to_vmem [thread:$0]  %s747_s0, 256, %s22_s9, [#allocation3], %s637_s11, %s637_s11, %s638_s12  }
  0x1b   :  { %s639_s1 = smov [#allocation7]   ;;  %s640_s16 = smov [#allocation8]  }
  0x1c   :  { %s47_s15 = sshll.u32 %s639_s1, 4  ;;  %s61_s17 = sshll.u32 %s640_s16, 4  ;;  %s48_s15 = int_to_ptr.vmem [resolvable:$true] %s47_s15  ;;  %s62_s17 = int_to_ptr.vmem [resolvable:$true] %s61_s17 }
  0x1d   :  { %s573_s18 = scalar_lea.vmem %s48_s15, 1024  ;;  %p578_p11 = scmp.lt.s32.totalorder %s48_s15, %s48_s15 }
  0x1e   :  { %p574_p10 = scmp.ne.s32.totalorder %s48_s15, %s573_s18  ;;  %p579_p12 = scmp.lt.s32.totalorder %s573_s18, %s573_s18 }
  0x20   :  { %p580_p13 = por %p579_p12, %p578_p11 }
  0x22   :  { %p581_p0 = pnand %p580_p13, %p574_p10 }
  0x24   :  { %584 = shalt.err (!%p581_p0)
}
  0x25   :  { %53 = dma.hbm_to_vmem [thread:$0]  %s750_s3, 1024, %s48_s15, [#allocation6], %s634_s27, %s634_s27, %s635_s28  }
  0x26   :  { %s593_s0 = scalar_lea.vmem %s62_s17, 1024  ;;  %p598_p2 = scmp.lt.s32.totalorder %s62_s17, %s62_s17 }
  0x27   :  { %p594_p1 = scmp.ne.s32.totalorder %s62_s17, %s593_s0  ;;  %p599_p3 = scmp.lt.s32.totalorder %s593_s0, %s593_s0 }
  0x29   :  { %p600_p4 = por %p599_p3, %p598_p2 }
  0x2b   :  { %p601_p5 = pnand %p600_p4, %p594_p1 }
  0x2d   :  { %604 = shalt.err (!%p601_p5)
}
  0x2e   :  { %67 = dma.hbm_to_vmem [thread:$0]  %s752_s5, 1024, %s62_s17, [#allocation9], %s634_s27, %s634_s27, %s635_s28  }
  0x2f   :  { %625 = dma.done.wait [#allocation3], 256  }
  0x30   :  { %626 = vsyncadd [#allocation3], 4294967040 }
  0x31   :  { %627 = dma.done.wait [#allocation6], 1280  }
  0x32   :  { %628 = vsyncadd [#allocation6], 4294966016 }
  0x33   :  { %629 = dma.done.wait [#allocation9], 1024  }
  0x34   :  { %630 = vsyncadd [#allocation9], 4294966272  ;;  %v641_v0 = vmov 0.0   ;;  %vm642_vm0 = vmmov 0   ;;  %v507_v1 = vld [vmem:[#allocation5 + $0x8] sm:$0xff]   ;;  %v508_v2 = vld [vmem:[#allocation5] sm:$0xff]  }
  0x35   :  { %448 = vmatprep.subr.bf16.mxu0 %v641_v0  ;;  %452 = vmatprep.mubr.msk.bf16.mxu0 %vm642_vm0, %v641_v0  ;;  %v83_v3 = vld [vmem:[#allocation2] sm:$0xff]  ;;  %v84_v4 = vld [vmem:[#allocation2 + $0x8] sm:$0xff]  ;;  %v509_v5 = vld [vmem:[#allocation7 + $0x38] sm:$0xff]   ;;  %vm109_vm1 = vcmask 261120   ;;  %s643_s26 = smov [#allocation10]  }
  0x36   :  { %456 = vmatprep.subr.bf16.mxu1 %v641_v0  ;;  %472 = vmatprep.mubr.msk.bf16.mxu1 %vm642_vm0, %v641_v0  ;;  %v90_v6 = vpack.c.bf16 %v84_v4, %v83_v3  ;;  %v510_v7 = vld [vmem:[#allocation7 + $0x30] sm:$0xff]   ;;  %v511_v8 = vld [vmem:[#allocation7 + $0x28] sm:$0xff]   ;;  %v512_v9 = vld [vmem:[#allocation7 + $0x20] sm:$0xff]   ;;  %s391_s27 = sshll.u32 %s643_s26, 4  ;;  %s392_s27 = int_to_ptr.vmem [resolvable:$true] %s391_s27 }
  0x37   :  { %449 = vmatpush3.bf16.msra.mxu0 %v507_v1  ;;  %457 = vmatpush3.bf16.msra.mxu1 %v509_v5  ;;  %v513_v10 = vld [vmem:[#allocation7 + $0x18] sm:$0xff]   ;;  %v514_v11 = vld [vmem:[#allocation7 + $0x10] sm:$0xff]   ;;  %v515_v12 = vld [vmem:[#allocation7 + $0x8] sm:$0xff]   ;;  %p610_p7 = scmp.lt.s32.totalorder %s392_s27, %s392_s27 }
  0x38   :  { %450 = vmatprep.subr.bf16.mxu0 %v641_v0  ;;  %458 = vmatprep.subr.bf16.mxu1 %v641_v0  ;;  %v516_v13 = vld [vmem:[#allocation7] sm:$0xff]   ;;  %v517_v14 = vld [vmem:[#allocation8 + $0x38] sm:$0xff]   ;;  %v518_v15 = vld [vmem:[#allocation8 + $0x30] sm:$0xff]  }
  0x39   :  { %v519_v16 = vld [vmem:[#allocation8 + $0x28] sm:$0xff]   ;;  %v520_v17 = vld [vmem:[#allocation8 + $0x20] sm:$0xff]   ;;  %v521_v18 = vld [vmem:[#allocation8 + $0x18] sm:$0xff]  }
  0x3a   :  { %v405_v19 = vld [vmem:[%s749_s2] ss:$0 sm:$0xff]  ;;  %v522_v29 = vld [vmem:[#allocation8 + $0x10] sm:$0xff]   ;;  %v523_v30 = vld [vmem:[#allocation8 + $0x8] sm:$0xff]  }
  0x3b   :  { %451 = vmatpush3.bf16.msra.mxu0 %v508_v2  ;;  %459 = vmatpush3.bf16.msra.mxu1 %v510_v7  ;;  %v524_v31 = vld [vmem:[#allocation8] sm:$0xff]  }
  0x3c   :  { %476 = vmatprep.subr.bf16.mxu0 %v641_v0  ;;  %460 = vmatprep.subr.bf16.mxu1 %v641_v0  ;;  %v409_v32 = vld [vmem:[%s751_s4] ss:$0 sm:$0xff]  ;;  %s605_s4 = scalar_lea.vmem %s392_s27, 256 }
  0x3d   :  { %v418_v42 = vld [vmem:[%s753_s6] ss:$0 sm:$0xff]  ;;  %p606_p6 = scmp.ne.s32.totalorder %s392_s27, %s605_s4  ;;  %p611_p8 = scmp.lt.s32.totalorder %s605_s4, %s605_s4 }
  0x3e   :  { %453 = vmatmul.mubr.msk.bf16.vlgmr.msra.gmra.mxu0 %vm109_vm1, %v90_v6 }
  0x3f   :  { %492 = vmatprep.mubr.msk.bf16.mxu0 %vm642_vm0, %v641_v0  ;;  %461 = vmatpush3.bf16.msra.mxu1 %v511_v8  ;;  %p612_p9 = por %p611_p8, %p610_p7 }
  0x40   :  { %462 = vmatprep.subr.bf16.mxu1 %v641_v0  ;;  %477 = vmatpush3.bf16.msra.mxu0 %v517_v14 }
  0x41   :  { %478 = vmatprep.subr.bf16.mxu0 %v641_v0  ;;  %p613_p10 = pnand %p612_p9, %p606_p6 }
  0x43   :  { %463 = vmatpush3.bf16.msra.mxu1 %v512_v9 }
  0x44   :  { %464 = vmatprep.subr.bf16.mxu1 %v641_v0  ;;  %479 = vmatpush3.bf16.msra.mxu0 %v518_v15 }
  0x45   :  { %480 = vmatprep.subr.bf16.mxu0 %v641_v0 }
  0x47   :  { %465 = vmatpush3.bf16.msra.mxu1 %v513_v10 }
  0x48   :  { %466 = vmatprep.subr.bf16.mxu1 %v641_v0  ;;  %481 = vmatpush3.bf16.msra.mxu0 %v519_v16 }
  0x49   :  { %482 = vmatprep.subr.bf16.mxu0 %v641_v0 }
  0x4b   :  { %467 = vmatpush3.bf16.msra.mxu1 %v514_v11 }
  0x4c   :  { %468 = vmatprep.subr.bf16.mxu1 %v641_v0  ;;  %483 = vmatpush3.bf16.msra.mxu0 %v520_v17 }
  0x4d   :  { %484 = vmatprep.subr.bf16.mxu0 %v641_v0 }
  0x4f   :  { %469 = vmatpush3.bf16.msra.mxu1 %v515_v12 }
  0x50   :  { %470 = vmatprep.subr.bf16.mxu1 %v641_v0  ;;  %485 = vmatpush3.bf16.msra.mxu0 %v521_v18 }
  0x51   :  { %486 = vmatprep.subr.bf16.mxu0 %v641_v0 }
  0x53   :  { %471 = vmatpush3.bf16.msra.mxu1 %v516_v13 }
  0x54   :  { %487 = vmatpush3.bf16.msra.mxu0 %v522_v29 }
  0x55   :  { %488 = vmatprep.subr.bf16.mxu0 %v641_v0 }
  0x58   :  { %489 = vmatpush3.bf16.msra.mxu0 %v523_v30 }
  0x59   :  { %490 = vmatprep.subr.bf16.mxu0 %v641_v0 }
  0x5c   :  { %491 = vmatpush3.bf16.msra.mxu0 %v524_v31 }
  0xfe   :  { %v147_v20 = vpop.f32.mrf.mxu0 }
  0xff   :  { %v148_v22 = vadd.f32 %v405_v19, %v147_v20 }
 0x100   :  { %v454_v21 = vpop.f32.mrf.mxu0 }
 0x101   :  { %v154_v26 = vmax.f32 %v148_v22, 0.0 }
 0x102   :  { %v150_v23 = vpop.f32.mrf.mxu0 }
 0x103   :  { %v151_v24 = vadd.f32 %v405_v19, %v150_v23 }
 0x104   :  { %v455_v25 = vpop.f32.mrf.mxu0 }
 0x105   :  { %v155_v27 = vmax.f32 %v151_v24, 0.0 }
 0x107   :  { %v173_v28 = vpack.c.bf16 %v155_v27, %v154_v26 }
 0x109   :  { %473 = vmatmul.mubr.bf16.vlgmr.msra.gmra.mxu1 %v173_v28 }
 0x1c9   :  { %v262_v33 = vpop.f32.mrf.mxu1 }
 0x1ca   :  { %v263_v35 = vadd.f32 %v409_v32, %v262_v33 }
 0x1cb   :  { %v474_v34 = vpop.f32.mrf.mxu1 }
 0x1cc   :  { %v269_v39 = vmax.f32 %v263_v35, 0.0 }
 0x1cd   :  { %v265_v36 = vpop.f32.mrf.mxu1 }
 0x1ce   :  { %v266_v37 = vadd.f32 %v409_v32, %v265_v36 }
 0x1cf   :  { %v475_v38 = vpop.f32.mrf.mxu1 }
 0x1d0   :  { %v270_v40 = vmax.f32 %v266_v37, 0.0 }
 0x1d2   :  { %v288_v41 = vpack.c.bf16 %v270_v40, %v269_v39 }
 0x1d4   :  { %493 = vmatmul.mubr.bf16.vlgmr.msra.gmra.mxu0 %v288_v41 }
 0x294   :  { %v377_v43 = vpop.f32.mrf.mxu0 }
 0x295   :  { %v378_v44 = vadd.f32 %v418_v42, %v377_v43 }
 0x296   :  { %v494_v45 = vpop.f32.mrf.mxu0 }
 0x297   :  { %384 = vst [vmem:[#allocation10] sm:$0xff] %v378_v44 }
 0x298   :  { %v380_v46 = vpop.f32.mrf.mxu0 }
 0x299   :  { %v381_v47 = vadd.f32 %v418_v42, %v380_v46 }
 0x29a   :  { %v495_v48 = vpop.f32.mrf.mxu0 }
 0x29b   :  { %385 = vst [vmem:[#allocation10 + $0x8] sm:$0xff] %v381_v47 }
 0x29c   :  { %616 = shalt.err (!%p613_p10)
}
 0x29d   :  { %397 = dma.vmem_to_hbm [thread:$0]  %s392_s27, 256, %s754_s7, [#allocation4], %s637_s11, %s637_s11, %s638_s12  }
 0x29e   :  { %631 = dma.done.wait [#allocation4], 256  }
 0x29f   :  { %632 = vsyncadd [#allocation4], 4294967040 }
 0x2a0   :  { %401 = vsyncpa [#allocation3], 1 }
 0x2a1   :  { %402 = vsyncpa [#allocation6], 1 }
 0x2a2   :  { %403 = vsyncpa [#allocation9], 1 }
 0x2a3   :  { %404 = vsyncpa [#allocation4], 1 }

</bundles_post_ra>
